<compile_context>
chip_gen: v6e
topology: v6e:2x2x1
jax: 0.10.0
libtpu: 0.0.40
codegen_flags: <defaults>
</compile_context>

<pallas_src>
import functools
import math

import jax
import jax.numpy as jnp
from jax.experimental import pallas as pl
from jax.experimental.pallas import tpu as pltpu


def _layernorm_kernel(x_ref, a_ref, b_ref, o_ref, *, eps, feat):
    x = x_ref[...].astype(jnp.float32)          # (TN, D) upcast for accumulation
    a = a_ref[...]                              # (1, D)  already f32
    b = b_ref[...]                              # (1, D)  already f32

    inv_d = 1.0 / feat
    inv_dm1 = 1.0 / (feat - 1) if feat > 1 else 1.0   # torch unbiased std

    # Single-pass statistics: one sweep over the (TN, D) tile.
    s1 = jnp.sum(x, axis=-1, keepdims=True)            # (TN, 1)
    s2 = jnp.sum(x * x, axis=-1, keepdims=True)        # (TN, 1)
    mean = s1 * inv_d
    var = (s2 - mean * s1) * inv_dm1                   # sum((x-mean)^2)/(D-1)
    var = jnp.maximum(var, 0.0)                        # guard fp round-off
    std = jnp.sqrt(var)

    # Row-wise reciprocal (O(TN) on the EUP); exact so the 1e-5 check holds.
    inv = pl.reciprocal(std + eps, approx=False)       # (TN, 1)

    y = (x - mean) * inv * a + b
    o_ref[...] = y.astype(o_ref.dtype)


def layer_norm(x, a_2, b_2, *, eps=1e-6):
    """LayerNorm over the last axis of x. a_2/b_2 have shape (features,)."""
    orig_shape = x.shape
    D = orig_shape[-1]
    assert a_2.shape == (D,) and b_2.shape == (D,)
    N = math.prod(orig_shape[:-1]) if len(orig_shape) > 1 else 1

    itemsize = jnp.dtype(x.dtype).itemsize
    sub = max(8, 32 // itemsize)                 # sublane packing: 8 f32, 16 bf16, 32 i8

    x2 = x.reshape(N, D)
    # Pad rows up to the sublane multiple so every tile is aligned; padded rows
    # are computed but discarded (eps > 0 keeps them finite / NaN-free).
    n_pad = pl.cdiv(N, sub) * sub
    if n_pad != N:
        x2 = jnp.pad(x2, ((0, n_pad - N), (0, 0)))

    # Cast scale/bias to f32 once here (no per-grid-step cast inside the kernel).
    a2 = a_2.astype(jnp.float32).reshape(1, D)
    b2 = b_2.astype(jnp.float32).reshape(1, D)

    # ---- Tile sizing (pure HBM-streaming kernel: 1 read + 1 write of x) ----
    # Target ~4 MiB of x per tile (2-8 MiB reaches ~85%+ of HBM roofline while
    # the ~0.35us per-grid-step overhead stays negligible).  VMEM per tile:
    #   2x double-buffered input + 2x double-buffered output (native dtype)
    #   + ~3 f32 temporaries (upcast x, centered x, y) inside the kernel body.
    bytes_per_row = D * itemsize
    per_row_vmem = 4 * bytes_per_row + 3 * D * 4
    vmem_limit_bytes = 48 * 1024 * 1024          # fits v7x's 64 MiB physical VMEM
    vmem_budget = 40 * 1024 * 1024               # headroom under the limit
    tile_x_target = 4 * 1024 * 1024              # ~4 MiB of x per tile

    tn = tile_x_target // max(bytes_per_row, 1)
    tn = min(tn, vmem_budget // max(per_row_vmem, 1))
    tn = max(sub, (tn // sub) * sub)             # dtype-aware sublane alignment
    # Keep at least 2 row blocks when possible so v7x's two TensorCores both
    # get work (grid axis is marked "parallel"); harmless on v5e/v6e.
    if n_pad >= 2 * sub:
        half = max(sub, ((n_pad // 2) // sub) * sub)
        tn = min(tn, half)
    tn = min(tn, n_pad)

    grid = (pl.cdiv(n_pad, tn),)
    kernel = functools.partial(_layernorm_kernel, eps=float(eps), feat=D)

    out = pl.pallas_call(
        kernel,
        grid=grid,
        in_specs=[
            pl.BlockSpec((tn, D), lambda i: (i, 0)),   # x rows tile
            pl.BlockSpec((1, D), lambda i: (0, 0)),    # scale (resident)
            pl.BlockSpec((1, D), lambda i: (0, 0)),    # bias  (resident)
        ],
        out_specs=pl.BlockSpec((tn, D), lambda i: (i, 0)),
        out_shape=jax.ShapeDtypeStruct((n_pad, D), x.dtype),
        compiler_params=pltpu.CompilerParams(
            dimension_semantics=("parallel",),         # rows are independent
            vmem_limit_bytes=vmem_limit_bytes,
        ),
    )(x2, a2, b2)

    if n_pad != N:
        out = out[:N]
    return out.reshape(orig_shape)


if __name__ == "__main__":
    # Small deterministic example consistent with the transformer module:
    # batch=2, seq=8, d_model=512 (lane-dense feature axis).
    B, S, D = 2, 8, 512
    EPS = 1e-6

    key = jax.random.PRNGKey(0)
    k_x, k_a, k_b = jax.random.split(key, 3)

    x = jax.random.normal(k_x, (B, S, D), dtype=jnp.float32)
    # Module initializes a_2=ones, b_2=zeros; perturb them to exercise scale/shift.
    a_2 = jnp.ones((D,), jnp.float32) + 0.1 * jax.random.normal(k_a, (D,), jnp.float32)
    b_2 = 0.1 * jax.random.normal(k_b, (D,), jnp.float32)

    out = layer_norm(x, a_2, b_2, eps=EPS)
    jax.block_until_ready(out)

    # Pure-JAX reference with torch semantics (unbiased std, eps added to std).
    mean_ref = jnp.mean(x, axis=-1, keepdims=True)
    std_ref = jnp.std(x, axis=-1, keepdims=True, ddof=1)
    ref = a_2 * (x - mean_ref) / (std_ref + EPS) + b_2

    assert jnp.allclose(out, ref, rtol=1e-5, atol=1e-5), "layernorm mismatch"

    print("KERNEL_OK")
</pallas_src>

<mosaic_0001>
module attributes {stable_mosaic.version = 11 : i64} {
  func.func @_layernorm_kernel(%arg0: i32, %arg1: memref<8x512xf32, #tpu.memory_space<vmem>>, %arg2: memref<1x512xf32, #tpu.memory_space<vmem>>, %arg3: memref<1x512xf32, #tpu.memory_space<vmem>>, %arg4: memref<8x512xf32, #tpu.memory_space<vmem>>) attributes {dimension_semantics = [#tpu.dimension_semantics<parallel>], iteration_bounds = array<i64: 2>, scalar_prefetch = 0 : i64, scratch_operands = 0 : i64, tpu.core_type = #tpu.core_type<tc>, window_params = [{transform_indices = @transform_0, window_bounds = array<i64: 8, 512>}, {pipeline_mode = #tpu.pipeline_mode<synchronous>, transform_indices = @transform_1, window_bounds = array<i64: 1, 512>}, {pipeline_mode = #tpu.pipeline_mode<synchronous>, transform_indices = @transform_2, window_bounds = array<i64: 1, 512>}, {transform_indices = @transform_3, window_bounds = array<i64: 8, 512>}]} {
    %c0 = arith.constant 0 : index
    %c0_0 = arith.constant 0 : index
    %0 = vector.load %arg1[%c0, %c0_0] : memref<8x512xf32, #tpu.memory_space<vmem>>, vector<8x512xf32>
    %c0_1 = arith.constant 0 : index
    %c0_2 = arith.constant 0 : index
    %1 = vector.load %arg2[%c0_1, %c0_2] : memref<1x512xf32, #tpu.memory_space<vmem>>, vector<1x512xf32>
    %c0_3 = arith.constant 0 : index
    %c0_4 = arith.constant 0 : index
    %2 = vector.load %arg3[%c0_3, %c0_4] : memref<1x512xf32, #tpu.memory_space<vmem>>, vector<1x512xf32>
    %cst = arith.constant dense<0.000000e+00> : vector<8xf32>
    %3 = vector.multi_reduction <add>, %0, %cst [1] : vector<8x512xf32> to vector<8xf32>
    %4 = vector.shape_cast %3 : vector<8xf32> to vector<8x1xf32>
    %5 = arith.mulf %0, %0 : vector<8x512xf32>
    %cst_5 = arith.constant dense<0.000000e+00> : vector<8xf32>
    %6 = vector.multi_reduction <add>, %5, %cst_5 [1] : vector<8x512xf32> to vector<8xf32>
    %7 = vector.shape_cast %6 : vector<8xf32> to vector<8x1xf32>
    %cst_6 = arith.constant 0.001953125 : f32
    %8 = vector.broadcast %cst_6 : f32 to vector<8x1xf32>
    %9 = arith.mulf %4, %8 : vector<8x1xf32>
    %10 = arith.mulf %9, %4 : vector<8x1xf32>
    %11 = arith.subf %7, %10 : vector<8x1xf32>
    %cst_7 = arith.constant 0.00195694715 : f32
    %12 = vector.broadcast %cst_7 : f32 to vector<8x1xf32>
    %13 = arith.mulf %11, %12 : vector<8x1xf32>
    %cst_8 = arith.constant 0.000000e+00 : f32
    %14 = vector.broadcast %cst_8 : f32 to vector<8x1xf32>
    %15 = arith.maximumf %13, %14 : vector<8x1xf32>
    %16 = math.sqrt %15 : vector<8x1xf32>
    %cst_9 = arith.constant 9.99999997E-7 : f32
    %17 = vector.broadcast %cst_9 : f32 to vector<8x1xf32>
    %18 = arith.addf %16, %17 : vector<8x1xf32>
    %19 = tpu.reciprocal %18 : vector<8x1xf32> -> vector<8x1xf32>
    %20 = vector.broadcast %9 : vector<8x1xf32> to vector<8x512xf32>
    %21 = arith.subf %0, %20 : vector<8x512xf32>
    %22 = vector.broadcast %19 : vector<8x1xf32> to vector<8x512xf32>
    %23 = arith.mulf %21, %22 : vector<8x512xf32>
    %24 = vector.broadcast %1 : vector<1x512xf32> to vector<8x512xf32>
    %25 = arith.mulf %23, %24 : vector<8x512xf32>
    %26 = vector.broadcast %2 : vector<1x512xf32> to vector<8x512xf32>
    %27 = arith.addf %25, %26 : vector<8x512xf32>
    %c0_10 = arith.constant 0 : index
    %c0_11 = arith.constant 0 : index
    %28 = vector.load %arg4[%c0_10, %c0_11] : memref<8x512xf32, #tpu.memory_space<vmem>>, vector<8x512xf32>
    tpu.vector_store %arg4[%c0_10, %c0_11], %27 {strides = array<i32>} : memref<8x512xf32, #tpu.memory_space<vmem>>, vector<8x512xf32>,
    return
  }
  func.func @transform_0(%arg0: i32) -> (i32, i32) {
    %c0_i32 = arith.constant 0 : i32
    %c0_i32_0 = arith.constant 0 : i32
    return %arg0, %c0_i32 : i32, i32
  }
  func.func @transform_1(%arg0: i32) -> (i32, i32) {
    %c0_i32 = arith.constant 0 : i32
    %c0_i32_0 = arith.constant 0 : i32
    %c0_i32_1 = arith.constant 0 : i32
    return %c0_i32, %c0_i32_0 : i32, i32
  }
  func.func @transform_2(%arg0: i32) -> (i32, i32) {
    %c0_i32 = arith.constant 0 : i32
    %c0_i32_0 = arith.constant 0 : i32
    %c0_i32_1 = arith.constant 0 : i32
    return %c0_i32, %c0_i32_0 : i32, i32
  }
  func.func @transform_3(%arg0: i32) -> (i32, i32) {
    %c0_i32 = arith.constant 0 : i32
    %c0_i32_0 = arith.constant 0 : i32
    return %arg0, %c0_i32 : i32, i32
  }
}

</mosaic_0001>

<bundles_post_ra>
// kernel: tpu_custom_call.1
= control target key start
LH: loop header
LB: loop body
LE: loop exit
PB: predicated region body
PF: predicated region fallthrough
CT: control target
= control target key end

     0   :  { %8 = vsyncpa [#allocation3], 0  ;;  %s858_s0 = inlined_call_operand.hbm [shape: f32[16,512], index: 0, kind: input, shape index: {}]   ;;  %s859_s1 = inlined_call_operand.hbm [shape: f32[1,512], index: 1, kind: input, shape index: {}]   ;;  %s860_s2 = inlined_call_operand.hbm [shape: f32[1,512], index: 2, kind: input, shape index: {}]   ;;  %s861_s3 = inlined_call_operand.hbm [shape: f32[16,512], index: 3, kind: output, shape index: {}]  }
   0x1   :  { %10 = vsyncpa [#allocation3 + $0x1], 0 }
   0x2   :  { %11 = vsyncpa [#allocation6], 0 }
   0x3   :  { %12 = vsyncpa [#allocation4], 0 }
   0x4   :  { %14 = vsyncpa [#allocation4 + $0x1], 0  ;;  %s677_s12 = smov 0   ;;  %s679_s13 = smov 0  }
   0x5   :  { %s681_s14 = smov 0   ;;  %s683_s15 = smov 0  }
   0x6 LB: > { %s698_s16 = sadd.s32 4294967295, %s651_s15   ;;  %s412_s17 = sadd.s32 4294967294, %s651_s15   ;;  %s651_s15 = sphi %s683_s15, %s883_s15   ;;  %s647_s14 = sphi %s681_s14, %s882_s14   ;;  %s643_s13 = sphi %s679_s13, %s881_s13   ;;  %s639_s12 = sphi %s677_s12, %s880_s12  }
   0x7   : > { %p40_p0 = scmp.ne.s32.totalorder %s643_s13, %s639_s12  ;;  %p862_p1 = scmp.eq.s32.totalorder %s698_s16, 0 }
   0x8   : > { %p112_p3 = scmp.eq.s32.totalorder %s412_s17, 1  ;;  %p413_p5 = scmp.ge.s32.totalorder %s651_s15, 1 }
   0x9   : > { %p707_p4 = por %p862_p1, %p40_p0  ;;  %p119_p7 = scmp.lt.s32.totalorder %s651_s15, 3 }
   0xa   : > { %p712_p6 = por %p112_p3, %p40_p0  ;;  %s653_s21 = smov [#allocation5]  }
   0xb   : > { %s866_s18 = scalar_select %p707_p4, 1, 0 }
   0xc   : > { %s867_s19 = scalar_select %p712_p6, 1, 0 }
   0xd   : > { %p717_p8 = pnand %p413_p5, %p119_p7  ;;  %s132_s22 = sshll.u32 %s653_s21, 4  ;;  %s133_s22 = int_to_ptr.vmem [resolvable:$true] %s132_s22 }
   0xe   : > { %s654_s23 = smov [#allocation7]   ;;  %s731_s26 = sadd.s32 1, %s651_s15  }
   0xf   : > { %s868_s20 = scalar_select %p717_p8, 1, 0 }
  0x10   : > { %p444_p10 = pneg %p717_p8  ;;  %s143_s24 = sshll.u32 %s654_s23, 4  ;;  %s144_s24 = int_to_ptr.vmem [resolvable:$true] %s143_s24 }
  0x11   : > { %s24_s27 = ssub.s32 %s651_s15, %s731_s26  ;;  %s514_s28 = scalar_lea.vmem %s133_s22, 64 }
  0x12   : > { %p726_p11 = pnand %p444_p10, %p862_p1  ;;  %p515_p13 = scmp.ne.s32.totalorder %s133_s22, %s514_s28 }
  0x13   : > { %p522_p5 = scmp.lt.s32.totalorder %s133_s22, %s133_s22  ;;  %p523_p7 = scmp.lt.s32.totalorder %s514_s28, %s514_s28 }
  0x14   : > { %p505_p12 = pneg %p726_p11 }
  0x15   : > { %p524_p10 = por %p523_p7, %p522_p5 }
  0x16   : > { %p517_p0 = pnand %p515_p13, %p505_p12 }
  0x18   : > { %p518_p3 = pneg %p517_p0 }
  0x1a   : > { %p525_p9 = pnand %p524_p10, %p518_p3 }
  0x1c   : > { %528 = shalt.err (!%p525_p9)
}
  0x1d   : > { %447 = dma.hbm_to_vmem [thread:$0]  (!%p726_p11), %s859_s1, 64, %s133_s22, [#allocation6]  }
  0x1e   : > { %s540_s4 = scalar_lea.vmem %s144_s24, 64  ;;  %p548_p13 = scmp.lt.s32.totalorder %s144_s24, %s144_s24 }
  0x1f   : > { %p541_p1 = scmp.ne.s32.totalorder %s144_s24, %s540_s4  ;;  %p549_p0 = scmp.lt.s32.totalorder %s540_s4, %s540_s4 }
  0x21   : > { %p543_p2 = pnand %p541_p1, %p505_p12  ;;  %p550_p4 = por %p549_p0, %p548_p13 }
  0x23   : > { %p544_p6 = pneg %p543_p2 }
  0x25   : > { %p551_p8 = pnand %p550_p4, %p544_p6 }
  0x27   : > { %554 = shalt.err (!%p551_p8)
}
  0x28   : > { %450 = dma.hbm_to_vmem [thread:$0]  (!%p726_p11), %s860_s2, 64, %s144_s24, [#allocation6]  }
  0x29   : > { %p25_p1 = scmp.eq.s32.totalorder %s24_s27, 0  ;;  %s27_s7 = sadd.s32 1, %s647_s14 }
  0x2a   : > { %p34_p2 = scmp.ne.s32.totalorder %s647_s14, %s643_s13  ;;  %p35_p4 = scmp.eq.s32.totalorder %s651_s15, 0 }
  0x2b   : > { %s758_s8 = scalar_select %p25_p1, %s647_s14, %s27_s7  }
  0x2c   : > { %p36_p6 = por %p35_p4, %p34_p2  ;;  %p870_p8 = scmp.eq.s32.totalorder %s698_s16, 1 }
  0x2d   : > { %p461_p12 = scmp.lt.s32.totalorder %s651_s15, 2  ;;  %s154_s10 = sand.u32 1, %s647_s14  }
  0x2e   : > { %p762_p9 = por %p870_p8, %p34_p2  ;;  %s417_s11 = sshll.u32 %s154_s10, 5 }
  0x2f   : > { %s430_s17 = sshll.u32 %s651_s15, 9  ;;  %s158_s24 = scalar_lea.vmem [#allocation2], %s417_s11 }
  0x30   : > { %s871_s9 = scalar_select %p762_p9, 1, 0 }
  0x31   : > { %s772_s23 = scalar_lea.hbm %s858_s0, %s430_s17  ;;  %s166_s25 = sshll.u32 %s158_s24, 4  ;;  %s167_s25 = int_to_ptr.vmem [resolvable:$true] %s166_s25 }
  0x32   : > { %p774_p11 = pnand %p461_p12, %p36_p6  ;;  %s155_s28 = scalar_lea.sflag [#allocation3], %s154_s10 }
  0x33   : > { %s555_s29 = scalar_lea.hbm %s772_s23, 512  ;;  %s560_s5 = scalar_lea.hbm %s858_s0, 1024 }
  0x34   : > { %p556_p3 = scmp.ne.s32.totalorder %s772_s23, %s555_s29  ;;  %p557_p5 = pneg %p774_p11 }
  0x35   : > { %p561_p13 = scmp.lt.s32.totalorder %s772_s23, %s858_s0  ;;  %p562_p0 = scmp.lt.s32.totalorder %s560_s5, %s555_s29 }
  0x36   : > { %p558_p7 = pnand %p557_p5, %p556_p3 }
  0x37   : > { %p563_p1 = por %p562_p0, %p561_p13 }
  0x38   : > { %p559_p10 = pneg %p558_p7 }
  0x3a   : > { %p564_p2 = pnand %p563_p1, %p559_p10 }
  0x3c   : > { %567 = shalt.err (!%p564_p2)
}
  0x3d   : > { %s568_s11 = scalar_lea.vmem %s167_s25, 512  ;;  %s655_s10 = smov [#allocation2]  }
  0x3e   : > { %p569_p4 = scmp.ne.s32.totalorder %s167_s25, %s568_s11  ;;  %s573_s17 = sshll.u32 %s655_s10, 4  ;;  %s574_s17 = int_to_ptr.vmem [resolvable:$false] %s573_s17 }
  0x3f   : > { %s575_s21 = scalar_lea.vmem %s574_s17, 1024  ;;  %p576_p12 = scmp.lt.s32.totalorder %s167_s25, %s574_s17 }
  0x40   : > { %p571_p6 = pnand %p569_p4, %p557_p5  ;;  %p577_p3 = scmp.lt.s32.totalorder %s575_s21, %s568_s11 }
  0x42   : > { %p572_p8 = pneg %p571_p6  ;;  %p578_p7 = por %p577_p3, %p576_p12 }
  0x44   : > { %p579_p9 = pnand %p578_p7, %p572_p8 }
  0x46   : > { %582 = shalt.err (!%p579_p9)
}
  0x47   : > { %454 = dma.hbm_to_vmem [thread:$0]  (!%p774_p11), %s772_s23, 512, %s167_s25, %s155_s28  }
  0x48   : > { %p873_p10 = scmp.ne.s32.totalorder %s868_s20, 0 }
  0x49   : > { %s795_s22 = sand.u32 (!%p873_p10), 1, %s643_s13   ;;  %p874_p5 = scmp.ne.s32.totalorder (!%p873_p10), %s866_s18, 0 }
  0x4a   : > { %175 = sbr.rel (%p873_p10) target bundleno = 292 (0x124), region = 32  ;;  %s421_s24 = sshll.u32 (!%p873_p10), %s795_s22, 5 }
  0x4b   : > { %s178_s29 = scalar_lea.sflag (!%p873_p10), [#allocation3], %s795_s22  ;;  %s181_s30 = scalar_lea.vmem (!%p873_p10), [#allocation2], %s421_s24 }
  0x4f   : > { %626 = dma.done.wait (%p874_p5), %s178_s29, 512  }
  0x50   : > { %628 = vsyncadd (%p874_p5), %s178_s29, 4294966784  ;;  %p875_p9 = scmp.eq.s32.totalorder %s698_s16, 0 }
  0x52   : > { %630 = dma.done.wait (%p875_p9), [#allocation6], 128   ;;  %p876_p11 = pmov %p875_p9 }
  0x53   : > { %v212_v0 = vld [vmem:[%s181_s30] sm:$0xff]  ;;  %v213_v1 = vld [vmem:[%s181_s30 + $0x8] sm:$0xff]  ;;  %v214_v2 = vld [vmem:[%s181_s30 + $0x10] sm:$0xff]  ;;  %v255_v27 = vlaneseq  ;;  %s431_s18 = sshll.u32 %s698_s16, 9  ;;  %s211_s20 = scalar_lea.vmem [#allocation8], %s421_s24 }
  0x54   : > { %632 = vsyncadd (%p876_p11), [#allocation6], 4294967168  ;;  %v218_v3 = vadd.f32 %v213_v1, %v212_v0  ;;  %v223_v4 = vmul.f32 %v212_v0, %v212_v0  ;;  %v224_v5 = vmul.f32 %v213_v1, %v213_v1  ;;  %v225_v6 = vmul.f32 %v214_v2, %v214_v2  ;;  %v215_v7 = vld [vmem:[%s181_s30 + $0x18] sm:$0xff]  ;;  %v216_v33 = vld [vmem:[#allocation5] sm:$0xf]  ;;  %s323_s23 = sshll.u32 %s211_s20, 4  ;;  %s815_s28 = scalar_lea.hbm %s861_s3, %s431_s18  ;;  %s817_s23 = int_to_ptr.vmem [resolvable:$true] %s323_s23 }
  0x55   : > { %v226_v9 = vmul.f32 %v215_v7, %v215_v7  ;;  %v256_v28 = vshrl.u32 %v255_v27, 7  ;;  %v217_v34 = vld [vmem:[#allocation7] sm:$0xf]  ;;  %s309_s16 = scalar_lea.sflag [#allocation4], %s795_s22  ;;  %s583_s4 = scalar_lea.vmem %s817_s23, 512 }
  0x56   : > { %v219_v8 = vadd.f32 %v218_v3, %v214_v2  ;;  %v227_v10 = vadd.f32 %v224_v5, %v223_v4  ;;  %p584_p13 = scmp.ne.s32.totalorder %s817_s23, %s583_s4  ;;  %p877_p0 = scmp.ne.s32.totalorder %s871_s9, 0 }
  0x57   : > { %v257_v29 = vsub.s32 0, %v256_v28  ;;  %v261_v30 = vsub.s32 1, %v256_v28  ;;  %v265_v31 = vsub.s32 2, %v256_v28  ;;  %v269_v32 = vsub.s32 3, %v256_v28  ;;  %s656_s5 = smov [#allocation8]  }
  0x58   : > { %v220_v11 = vadd.f32 %v219_v8, %v215_v7  ;;  %v228_v12 = vadd.f32 %v227_v10, %v225_v6  ;;  %p585_p1 = pnand %p584_p13, %p877_p0  ;;  %s587_s6 = sshll.u32 %s656_s5, 4  ;;  %s588_s6 = int_to_ptr.vmem [resolvable:$false] %s587_s6 }
  0x59   : > { %v258_v35 = vrot.slane %v216_v33, %v257_v29  ;;  %v262_v36 = vrot.slane %v216_v33, %v261_v30  ;;  %v266_v37 = vrot.slane %v216_v33, %v265_v31  ;;  %v270_v38 = vrot.slane %v216_v33, %v269_v32  ;;  %s589_s7 = scalar_lea.vmem %s588_s6, 1024  ;;  %p590_p4 = scmp.lt.s32.totalorder %s817_s23, %s588_s6 }
  0x5a   : > { %221 = vadd.xlane.f32.xlu0 %v220_v11  ;;  %v229_v13 = vadd.f32 %v228_v12, %v226_v9  ;;  %v283_v44 = vrot.slane %v217_v34, %v257_v29  ;;  %v287_v45 = vrot.slane %v217_v34, %v261_v30  ;;  %v291_v46 = vrot.slane %v217_v34, %v265_v31  ;;  %p586_p2 = pneg %p585_p1  ;;  %p591_p6 = scmp.lt.s32.totalorder %s589_s7, %s583_s4 }
  0x5b   : > { %v295_v47 = vrot.slane %v217_v34, %v269_v32 }
  0x5c   : > { %p592_p8 = por %p591_p6, %p590_p4 }
  0x5e   : > { %230 = vadd.xlane.f32.xlu0 %v229_v13  ;;  %p593_p12 = pnand %p592_p8, %p586_p2 }
  0xe3   : > { %v222_v14 = vpop.xlane.xlu0 %221 }
  0xe4   : > { %v232_v15 = vmul.f32 0.001953125, %v222_v14 }
  0xe6   : > { %v233_v16 = vmul.f32 %v232_v15, %v222_v14  ;;  %v246_v39 = vsub.f32 %v212_v0, %v232_v15  ;;  %v247_v40 = vsub.f32 %v213_v1, %v232_v15  ;;  %v248_v41 = vsub.f32 %v214_v2, %v232_v15 }
  0xe7   : > { %v231_v17 = vpop.xlane.xlu0 %230  ;;  %v249_v42 = vsub.f32 %v215_v7, %v232_v15 }
  0xe8   : > { %v234_v18 = vsub.f32 %v231_v17, %v233_v16 }
  0xea   : > { %v235_v19 = vmul.f32 0.0019569471, %v234_v18 }
  0xec   : > { %v236_v20 = vmax.f32 %v235_v19, 0.0 }
  0xee   : > { %499 = vrsqrt.f32 %v236_v20  ;;  %vm239_vm0 = vcmp.eq.f32.partialorder %v236_v20, inf  ;;  %v242_v23 = vand.u32 2147483648, %v236_v20  ;;  %vm241_vm1 = vcmp.eq.f32.partialorder %v236_v20, 0.0 }
  0xfb   : > { %v500_v21 = vpop.eup %499 }
  0xfc   : > { %v238_v22 = vmul.f32 %v500_v21, %v236_v20 }
  0xfe   : > { %v240_v24 = vsel %vm239_vm0, %v236_v20, %v238_v22 }
  0xff   : > { %v243_v25 = vsel %vm241_vm1, %v242_v23, %v240_v24 }
 0x100   : > { %v244_v26 = vadd.f32 1e-06, %v243_v25 }
 0x102   : > { %501 = vrcp.f32 %v244_v26 }
 0x10f   : > { %v502_v43 = vpop.eup %501 }
 0x110   : > { %v250_v48 = vmul.f32 %v502_v43, %v246_v39  ;;  %v251_v49 = vmul.f32 %v502_v43, %v247_v40  ;;  %v252_v50 = vmul.f32 %v502_v43, %v248_v41  ;;  %v253_v51 = vmul.f32 %v502_v43, %v249_v42 }
 0x112   : > { %v275_v52 = vmul.f32 %v258_v35, %v250_v48  ;;  %v276_v53 = vmul.f32 %v262_v36, %v251_v49  ;;  %v277_v54 = vmul.f32 %v266_v37, %v252_v50  ;;  %v278_v55 = vmul.f32 %v270_v38, %v253_v51 }
 0x114   : > { %v300_v56 = vadd.f32 %v283_v44, %v275_v52  ;;  %v301_v57 = vadd.f32 %v287_v45, %v276_v53  ;;  %v302_v58 = vadd.f32 %v291_v46, %v277_v54  ;;  %v303_v59 = vadd.f32 %v295_v47, %v278_v55 }
 0x116   : > { %304 = vst [vmem:[%s211_s20] sm:$0xff] %v300_v56  ;;  %305 = vst [vmem:[%s211_s20 + $0x8] sm:$0xff] %v301_v57 }
 0x117   : > { %306 = vst [vmem:[%s211_s20 + $0x10] sm:$0xff] %v302_v58  ;;  %307 = vst [vmem:[%s211_s20 + $0x18] sm:$0xff] %v303_v59 }
 0x118   : > { %596 = shalt.err (!%p593_p12)
}
 0x119   : > { %s597_s11 = scalar_lea.hbm %s815_s28, 512  ;;  %s601_s21 = scalar_lea.hbm %s861_s3, 1024 }
 0x11a   : > { %p598_p3 = scmp.ne.s32.totalorder %s815_s28, %s597_s11  ;;  %p602_p5 = scmp.lt.s32.totalorder %s815_s28, %s861_s3 }
 0x11b   : > { %p603_p9 = scmp.lt.s32.totalorder %s601_s21, %s597_s11 }
 0x11c   : > { %p599_p7 = pnand %p598_p3, %p877_p0 }
 0x11d   : > { %p604_p11 = por %p603_p9, %p602_p5 }
 0x11e   : > { %p600_p10 = pneg %p599_p7 }
 0x120   : > { %p605_p13 = pnand %p604_p11, %p600_p10 }
 0x122   : > { %608 = shalt.err (!%p605_p13)
}
 0x123   : > { %442 = dma.vmem_to_hbm [thread:$0]  (%p877_p0), %s817_s23, 512, %s815_s28, %s309_s16  }
 0x124 PF: > { %s335_s29 = sand.u32 1, %s639_s12   ;;  %p878_p1 = scmp.ne.s32.totalorder %s867_s19, 0 }
 0x125   : > { %p879_p2 = scmp.ge.s32.totalorder %s651_s15, 2  ;;  %s336_s30 = scalar_lea.sflag [#allocation4], %s335_s29 }
 0x127   : > { %p456_p4 = pnand %p879_p2, %p878_p1 }
 0x129   : > { %p457_p6 = pneg %p456_p4 }
 0x12b   : > { %634 = dma.done.wait (%p457_p6), %s336_s30, 512  }
 0x12c   : > { %636 = vsyncadd (%p457_p6), %s336_s30, 4294966784  ;;  %p17_p8 = scmp.ge.s32.totalorder %s731_s26, 4   ;;  %s880_s12 = smov %s643_s13 }
 0x12d   : > { %s881_s13 = smov %s647_s14  ;;  %s882_s14 = smov %s758_s8 }
 0x12e   : > { %s883_s15 = smov %s731_s26  ;;  %19 = sbr.rel (!%p17_p8) target bundleno = 6 (0x6), region = 85 }
 0x133   :  { %341 = vsyncpa [#allocation3], 1 }
 0x134   :  { %343 = vsyncpa [#allocation3 + $0x1], 1 }
 0x135   :  { %344 = vsyncpa [#allocation6], 1 }
 0x136   :  { %345 = vsyncpa [#allocation4], 1 }
 0x137   :  { %347 = vsyncpa [#allocation4 + $0x1], 1 }

</bundles_post_ra>
